<compile_context>
chip_gen: v6e
topology: v6e:2x2x1
jax: 0.10.0
libtpu: 0.0.40
codegen_flags: <defaults>
</compile_context>

<pallas_src>
import numpy as np
import jax
import jax.numpy as jnp
from jax import lax
from jax.experimental import pallas as pl
from jax.experimental.pallas import tpu as pltpu


# ----------------------------------------------------------------------------
# Bilinear interpolation helpers (PyTorch F.interpolate, align_corners=False)
# ----------------------------------------------------------------------------
def _bilinear_taps(out_size: int, in_size: int):
    o = np.arange(out_size, dtype=np.float64)
    src = np.maximum((o + 0.5) * (in_size / out_size) - 0.5, 0.0)
    i0 = np.minimum(np.floor(src).astype(np.int32), in_size - 1)
    i1 = np.minimum(i0 + 1, in_size - 1)
    frac = (src - i0).astype(np.float32)
    return i0, i1, frac


def _bilinear_matrix(out_size: int, in_size: int) -> np.ndarray:
    i0, i1, f = _bilinear_taps(out_size, in_size)
    R = np.zeros((out_size, in_size), dtype=np.float32)
    R[np.arange(out_size), i0] += 1.0 - f
    R[np.arange(out_size), i1] += f
    return R


def _pick_tile_rows(H: int, W: int, Cin: int, Cout: int,
                    target_lanes: int = 2048, max_rows: int = 32,
                    vmem_budget: int = 24 * 2 ** 20) -> int:
    """Output rows per spatial tile.  (rows*W) must be a multiple of 128 lanes
    unless the tile is the full image; keep the (unrolled) row count and the
    double-buffered VMEM footprint bounded."""
    cands = [d for d in range(1, H + 1)
             if H % d == 0 and ((d * W) % 128 == 0 or d == H)]
    if not cands:
        return H

    def vmem_est(d):
        tsp = d * W
        return 2 * (Cin * tsp * 2 + Cout * tsp * 2)   # bf16 in + bf16 out, 2x buffered

    ok = [d for d in cands if d <= max_rows and vmem_est(d) <= vmem_budget]
    if not ok:
        ok = [min(cands)]
    for d in sorted(ok):
        if d * W >= target_lanes:
            return d
    return max(ok)


# ----------------------------------------------------------------------------
# Pre-pass kernel (grid = (B,)): fused global conv (emb | gate) + h_sigmoid +
# W-direction bilinear upsample.  Output gup[b*Hg + h] = (2*Cout, W) f32.
# ----------------------------------------------------------------------------
def _global_kernel(xg_ref, wcat_ref, bcat_ref, rwT_ref, gup_ref):
    c2 = wcat_ref.shape[0]              # 2*Cout
    c_out = c2 // 2
    hg_sz = gup_ref.shape[0]            # Hg
    wg_sz = rwT_ref.shape[0]            # Wg

    # fused (emb | gate) 1x1 conv with folded BN
    gcat = jnp.dot(wcat_ref[...], xg_ref[0],
                   preferred_element_type=jnp.float32) + bcat_ref[...]   # (2C, Hg*Wg)
    # h_sigmoid on the gate half via a row mask (no concat/slice round trip)
    rid = lax.broadcasted_iota(jnp.int32, gcat.shape, 0)
    hsig = jnp.clip(gcat + 3.0, 0.0, 6.0) * (1.0 / 6.0)
    feat = jnp.where(rid < c_out, gcat, hsig)                            # (2C, Hg*Wg) f32

    # W-direction bilinear upsample, kept fully in f32 (interp accuracy)
    rwT = rwT_ref[...]                                                   # (Wg, W) f32
    for hg in range(hg_sz):                                              # cold path, tiny
        blk = feat[:, hg * wg_sz:(hg + 1) * wg_sz]                       # (2C, Wg)
        gup_ref[hg] = jnp.dot(blk, rwT, preferred_element_type=jnp.float32)


# ----------------------------------------------------------------------------
# Hot kernel (grid = (B, H // tile_rows)):
#   local 1x1 conv + 2-tap H-lerp of the pre-upsampled global features +
#   gated fuse + residual add, one lane-dense full-tile store.
# ----------------------------------------------------------------------------
def _fuse_kernel(i0_ref, i1_ref, fr_ref,      # SMEM H-tap tables (H,)
                 xl_ref, gup_ref,             # (1,Cin,tsp) bf16 / (Hg,2C,W) f32
                 wl_ref, bl_ref,              # folded local conv+BN
                 out_ref):                    # (1, Cout, tsp) bf16
    c_out = wl_ref.shape[0]
    w_out = gup_ref.shape[2]
    tsp = xl_ref.shape[2]
    th_rows = tsp // w_out
    t = pl.program_id(1)

    xl = xl_ref[0]                                                       # (Cin, tsp) bf16
    local = jnp.dot(wl_ref[...], xl,
                    preferred_element_type=jnp.float32) + bl_ref[...]   # (Cout, tsp) f32

    # 2-tap H interpolation of the (already W-upsampled) global features.
    # Each output row reads two small (2C, W) slabs; the fused FMA + store
    # below is a single full-tile, lane-dense operation.
    rows = []
    for r in range(th_rows):                                             # static unroll
        h = t * th_rows + r                                              # absolute row
        lo = i0_ref[h]
        hi = i1_ref[h]
        f = fr_ref[h]
        rows.append(gup_ref[lo] * (1.0 - f) + gup_ref[hi] * f)           # (2C, W) f32
    gs = jnp.concatenate(rows, axis=1)                                   # (2C, tsp) f32
    g_full = gs[:c_out]                                                  # embedding
    s_full = gs[c_out:]                                                  # gate

    # Residual(m): out = x + local * gate + embedding   (single full-tile store)
    out_ref[0] = (xl.astype(jnp.float32) + local * s_full + g_full).astype(out_ref.dtype)


# ----------------------------------------------------------------------------
# Wrapper: NCHW in / NCHW out.  Only free reshapes + parameter folding here.
# ----------------------------------------------------------------------------
def _fold_conv_bn(w, b, gamma, beta, mean, var, eps=1e-5):
    # w: (Cout, Cin), b: (Cout,) -> bf16 (Cout, Cin) weight, f32 (Cout, 1) bias
    s = gamma / jnp.sqrt(var + eps)
    w_f = (w * s[:, None]).astype(jnp.bfloat16)
    b_f = (b * s + beta - mean * s)[:, None].astype(jnp.float32)
    return w_f, b_f


def residual_scale_aware_gate(x_l, x_g, params, *, tile_rows=None,
                              out_dtype=jnp.bfloat16):
    B, Cin, H, W = x_l.shape
    Bg, Cg, Hg, Wg = x_g.shape
    assert (Bg, Cg) == (B, Cin)
    Cout = params["w_loc"].shape[0]
    assert Cin == Cout, "Residual(x + m(x)) requires Cin == Cout"
    HW, HgWg = H * W, Hg * Wg

    th = tile_rows if tile_rows is not None else _pick_tile_rows(H, W, Cin, Cout)
    assert H % th == 0, "tile_rows must divide H"
    assert th == H or (th * W) % 128 == 0, "tile width must be a multiple of 128 lanes"
    n_t = H // th
    tsp = th * W

    # NCHW -> (B, C, H*W): free reshape, no transpose.
    xl2 = x_l.reshape(B, Cin, HW).astype(jnp.bfloat16)
    xg2 = x_g.reshape(B, Cin, HgWg).astype(jnp.bfloat16)

    # Separable bilinear: H via 2-tap SMEM tables, W via a small f32 matmul.
    i0_np, i1_np, fr_np = _bilinear_taps(H, Hg)
    i0 = jnp.asarray(i0_np, jnp.int32)
    i1 = jnp.asarray(i1_np, jnp.int32)
    fr = jnp.asarray(fr_np, jnp.float32)
    rwT = jnp.asarray(_bilinear_matrix(W, Wg).T, dtype=jnp.float32)      # (Wg, W) f32

    wl, bl = _fold_conv_bn(params["w_loc"], params["b_loc"],
                           params["g1"], params["be1"], params["m1"], params["v1"])
    wg_, bg_ = _fold_conv_bn(params["w_glob"], params["b_glob"],
                             params["g2"], params["be2"], params["m2"], params["v2"])
    wa_, ba_ = _fold_conv_bn(params["w_act"], params["b_act"],
                             params["g3"], params["be3"], params["m3"], params["v3"])
    wcat = jnp.concatenate([wg_, wa_], axis=0)    # (2*Cout, Cin) bf16, fused branches
    bcat = jnp.concatenate([bg_, ba_], axis=0)    # (2*Cout, 1)   f32

    # ---------------- pre-pass: global branch, once per batch element -------
    pre_spec = pltpu.PrefetchScalarGridSpec(
        num_scalar_prefetch=0,
        grid=(B,),
        in_specs=[
            pl.BlockSpec((1, Cin, HgWg), lambda b: (b, 0, 0)),           # x_g
            pl.BlockSpec((2 * Cout, Cin), lambda b: (0, 0)),             # w_glob | w_act
            pl.BlockSpec((2 * Cout, 1), lambda b: (0, 0)),               # b_glob | b_act
            pl.BlockSpec((Wg, W), lambda b: (0, 0)),                     # Rw^T (f32)
        ],
        out_specs=pl.BlockSpec((Hg, 2 * Cout, W), lambda b: (b, 0, 0)),
    )
    gup = pl.pallas_call(
        _global_kernel,
        out_shape=jax.ShapeDtypeStruct((B * Hg, 2 * Cout, W), jnp.float32),
        grid_spec=pre_spec,
        compiler_params=pltpu.CompilerParams(dimension_semantics=("parallel",)),
    )(xg2, wcat, bcat, rwT)

    # ---------------- hot kernel: local conv + H-lerp + fuse + residual -----
    out_bytes = jnp.dtype(out_dtype).itemsize
    lane_pad = lambda n: ((n + 127) // 128) * 128
    est = (2 * (Cin * tsp * 2) + 2 * (Cout * tsp * out_bytes)
           + 2 * (Hg * 2 * Cout * lane_pad(W) * 4)
           + Cout * Cin * 2 + 3 * Cout * 4 + 12 * H)
    vmem_limit = int(min(max(6 * est, 16 * 2 ** 20), 64 * 2 ** 20))

    flops = (2 * B * HW * Cin * Cout + 2 * B * HgWg * Cin * 2 * Cout
             + 2 * B * Hg * Wg * W * 2 * Cout + 12 * B * HW * Cout)
    bytes_accessed = (2 * B * Cin * (HW + HgWg)
                      + 2 * 4 * B * Hg * 2 * Cout * W
                      + out_bytes * B * Cout * HW
                      + 2 * 3 * Cout * Cin + 4 * 3 * Cout + 12 * H)

    grid_spec = pltpu.PrefetchScalarGridSpec(
        num_scalar_prefetch=0,
        grid=(B, n_t),
        in_specs=[
            pl.BlockSpec(memory_space=pltpu.MemorySpace.SMEM),           # i0 taps
            pl.BlockSpec(memory_space=pltpu.MemorySpace.SMEM),           # i1 taps
            pl.BlockSpec(memory_space=pltpu.MemorySpace.SMEM),           # frac
            pl.BlockSpec((1, Cin, tsp), lambda b, t: (b, 0, t)),         # x_l tile
            pl.BlockSpec((Hg, 2 * Cout, W), lambda b, t: (b, 0, 0)),     # gup (per batch)
            pl.BlockSpec((Cout, Cin), lambda b, t: (0, 0)),              # w_loc
            pl.BlockSpec((Cout, 1), lambda b, t: (0, 0)),                # b_loc
        ],
        out_specs=pl.BlockSpec((1, Cout, tsp), lambda b, t: (b, 0, t)),
    )

    out_flat = pl.pallas_call(
        _fuse_kernel,
        out_shape=jax.ShapeDtypeStruct((B, Cout, HW), out_dtype),
        grid_spec=grid_spec,
        compiler_params=pltpu.CompilerParams(
            dimension_semantics=("parallel", "parallel"),
            vmem_limit_bytes=vmem_limit,
        ),
        cost_estimate=pl.CostEstimate(flops=flops, transcendentals=0,
                                      bytes_accessed=bytes_accessed),
    )(i0, i1, fr, xl2, gup, wl, bl)

    # (B, Cout, H*W) -> NCHW: free reshape.
    return out_flat.reshape(B, Cout, H, W)


# ----------------------------------------------------------------------------
# Pure-JAX reference (independent path: einsum conv + gather-based bilinear)
# ----------------------------------------------------------------------------
def _bilinear_resize_nchw(x, H, W):
    B, C, Hin, Win = x.shape
    h0, h1, fh = _bilinear_taps(H, Hin)
    w0, w1, fw = _bilinear_taps(W, Win)
    x00 = x[:, :, h0][:, :, :, w0]
    x01 = x[:, :, h0][:, :, :, w1]
    x10 = x[:, :, h1][:, :, :, w0]
    x11 = x[:, :, h1][:, :, :, w1]
    fh = fh[None, None, :, None]
    fw = fw[None, None, None, :]
    top = x00 * (1 - fw) + x01 * fw
    bot = x10 * (1 - fw) + x11 * fw
    return top * (1 - fh) + bot * fh


def ref_forward(x_l, x_g, p):
    def conv_bn(x, w, b, gamma, beta, mean, var, eps=1e-5):
        y = jnp.einsum("bchw,oc->bohw", x, w) + b[None, :, None, None]
        s = gamma / jnp.sqrt(var + eps)
        return y * s[None, :, None, None] + (beta - mean * s)[None, :, None, None]

    B, C, H, W = x_l.shape
    local = conv_bn(x_l, p["w_loc"], p["b_loc"], p["g1"], p["be1"], p["m1"], p["v1"])
    g_emb = conv_bn(x_g, p["w_glob"], p["b_glob"], p["g2"], p["be2"], p["m2"], p["v2"])
    g_act = conv_bn(x_g, p["w_act"], p["b_act"], p["g3"], p["be3"], p["m3"], p["v3"])
    sig = jnp.clip(g_act + 3.0, 0.0, 6.0) / 6.0
    g_up = _bilinear_resize_nchw(g_emb, H, W)
    s_up = _bilinear_resize_nchw(sig, H, W)
    return x_l + (local * s_up + g_up)       # Residual: x + m(x)


# ----------------------------------------------------------------------------
if __name__ == "__main__":
    B, Cin, Cout = 2, 16, 16                 # Residual requires Cin == Cout
    H = W = 16
    Hg = Wg = 8

    key = jax.random.PRNGKey(0)
    ks = jax.random.split(key, 8)

    params = {
        "w_loc":  0.1 * jax.random.normal(ks[0], (Cout, Cin), jnp.float32),
        "b_loc":  0.05 * jax.random.normal(ks[1], (Cout,), jnp.float32),
        "w_glob": 0.1 * jax.random.normal(ks[2], (Cout, Cin), jnp.float32),
        "b_glob": 0.05 * jax.random.normal(ks[3], (Cout,), jnp.float32),
        "w_act":  0.1 * jax.random.normal(ks[4], (Cout, Cin), jnp.float32),
        "b_act":  0.05 * jax.random.normal(ks[5], (Cout,), jnp.float32),
        # Deterministic (eval-mode) BatchNorm parameters for each branch.
        "g1": 1.0 + 0.02 * jnp.arange(Cout, dtype=jnp.float32),
        "be1": 0.01 * jnp.arange(Cout, dtype=jnp.float32),
        "m1": 0.03 * jnp.arange(Cout, dtype=jnp.float32),
        "v1": 1.0 + 0.05 * jnp.arange(Cout, dtype=jnp.float32),
        "g2": 1.0 - 0.01 * jnp.arange(Cout, dtype=jnp.float32),
        "be2": -0.02 * jnp.arange(Cout, dtype=jnp.float32),
        "m2": 0.01 * jnp.arange(Cout, dtype=jnp.float32),
        "v2": 1.0 + 0.03 * jnp.arange(Cout, dtype=jnp.float32),
        "g3": 1.0 + 0.015 * jnp.arange(Cout, dtype=jnp.float32),
        "be3": 0.02 * jnp.arange(Cout, dtype=jnp.float32),
        "m3": -0.02 * jnp.arange(Cout, dtype=jnp.float32),
        "v3": 1.0 + 0.04 * jnp.arange(Cout, dtype=jnp.float32),
    }

    x_l = jax.random.normal(ks[6], (B, Cin, H, W), jnp.float32)
    x_g = jax.random.normal(ks[7], (B, Cin, Hg, Wg), jnp.float32)

    # tile_rows=8 -> 2 spatial tiles per batch element (exercises the tiled
    # path and the per-batch reuse of the pre-upsampled global features).
    out = residual_scale_aware_gate(x_l, x_g, params, tile_rows=8)
    out = jax.block_until_ready(out)

    ref = ref_forward(x_l, x_g, params)
    # bf16 matmul operands + bf16 output (f32 accumulation) -> relaxed tolerance.
    np.testing.assert_allclose(np.asarray(out.astype(jnp.float32)),
                               np.asarray(ref), rtol=3e-2, atol=3e-2)

    print("KERNEL_OK")
</pallas_src>

<mosaic_0001>
module attributes {stable_mosaic.version = 11 : i64} {
  func.func @_global_kernel(%arg0: i32, %arg1: memref<1x16x64xbf16, #tpu.memory_space<vmem>>, %arg2: memref<32x16xbf16, #tpu.memory_space<vmem>>, %arg3: memref<32x1xf32, #tpu.memory_space<vmem>>, %arg4: memref<8x16xf32, #tpu.memory_space<vmem>>, %arg5: memref<8x32x16xf32, #tpu.memory_space<vmem>>) attributes {dimension_semantics = [#tpu.dimension_semantics<parallel>], iteration_bounds = array<i64: 2>, scalar_prefetch = 0 : i64, scratch_operands = 0 : i64, tpu.core_type = #tpu.core_type<tc>, window_params = [{transform_indices = @transform_0, window_bounds = array<i64: 1, 16, 64>}, {pipeline_mode = #tpu.pipeline_mode<synchronous>, transform_indices = @transform_1, window_bounds = array<i64: 32, 16>}, {pipeline_mode = #tpu.pipeline_mode<synchronous>, transform_indices = @transform_2, window_bounds = array<i64: 32, 1>}, {pipeline_mode = #tpu.pipeline_mode<synchronous>, transform_indices = @transform_3, window_bounds = array<i64: 8, 16>}, {transform_indices = @transform_4, window_bounds = array<i64: 8, 32, 16>}]} {
    %c0 = arith.constant 0 : index
    %c0_0 = arith.constant 0 : index
    %0 = vector.load %arg2[%c0, %c0_0] : memref<32x16xbf16, #tpu.memory_space<vmem>>, vector<32x16xbf16>
    %c0_1 = arith.constant 0 : index
    %c0_2 = arith.constant 0 : index
    %c0_3 = arith.constant 0 : index
    %1 = vector.load %arg1[%c0_1, %c0_2, %c0_3] : memref<1x16x64xbf16, #tpu.memory_space<vmem>>, vector<1x16x64xbf16>
    %2 = vector.shape_cast %1 : vector<1x16x64xbf16> to vector<16x64xbf16>
    %cst = arith.constant dense<0.000000e+00> : vector<32x64xf32>
    %3 = tpu.matmul %0, %2, %cst {dimension_numbers = #tpu.dot_dimension_numbers<[1], [0], [0], [1], [0, 0, 1, 1], [], []>} : vector<32x16xbf16>, vector<16x64xbf16>, vector<32x64xf32> -> vector<32x64xf32>
    %c0_4 = arith.constant 0 : index
    %c0_5 = arith.constant 0 : index
    %4 = vector.load %arg3[%c0_4, %c0_5] : memref<32x1xf32, #tpu.memory_space<vmem>>, vector<32x1xf32>
    %5 = vector.broadcast %4 : vector<32x1xf32> to vector<32x64xf32>
    %6 = arith.addf %3, %5 : vector<32x64xf32>
    %7 = tpu.iota {dimensions = array<i32: 0>} : vector<32x64xi32>
    %cst_6 = arith.constant 3.000000e+00 : f32
    %8 = vector.broadcast %cst_6 : f32 to vector<32x64xf32>
    %9 = arith.addf %6, %8 : vector<32x64xf32>
    %cst_7 = arith.constant 0.000000e+00 : f32
    %cst_8 = arith.constant 6.000000e+00 : f32
    %10 = vector.broadcast %cst_7 : f32 to vector<32x64xf32>
    %11 = arith.maximumf %10, %9 : vector<32x64xf32>
    %12 = vector.broadcast %cst_8 : f32 to vector<32x64xf32>
    %13 = arith.minimumf %12, %11 : vector<32x64xf32>
    %cst_9 = arith.constant 0.166666672 : f32
    %14 = vector.broadcast %cst_9 : f32 to vector<32x64xf32>
    %15 = arith.mulf %13, %14 : vector<32x64xf32>
    %c16_i32 = arith.constant 16 : i32
    %16 = vector.broadcast %c16_i32 : i32 to vector<32x64xi32>
    %17 = arith.cmpi slt, %7, %16 : vector<32x64xi32>
    %18 = arith.select %17, %6, %15 : vector<32x64xi1>, vector<32x64xf32>
    %c0_10 = arith.constant 0 : index
    %c0_11 = arith.constant 0 : index
    %19 = vector.load %arg4[%c0_10, %c0_11] : memref<8x16xf32, #tpu.memory_space<vmem>>, vector<8x16xf32>
    %20 = vector.extract_strided_slice %18 {offsets = [0, 0], sizes = [32, 8], strides = [1, 1]} : vector<32x64xf32> to vector<32x8xf32>
    %cst_12 = arith.constant dense<0.000000e+00> : vector<32x16xf32>
    %21 = tpu.matmul %20, %19, %cst_12 {dimension_numbers = #tpu.dot_dimension_numbers<[1], [0], [0], [1], [0, 0, 1, 1], [], []>} : vector<32x8xf32>, vector<8x16xf32>, vector<32x16xf32> -> vector<32x16xf32>
    %c0_13 = arith.constant 0 : index
    %c0_14 = arith.constant 0 : index
    %c0_15 = arith.constant 0 : index
    %22 = vector.load %arg5[%c0_13, %c0_14, %c0_15] : memref<8x32x16xf32, #tpu.memory_space<vmem>>, vector<1x32x16xf32>
    %23 = vector.shape_cast %22 : vector<1x32x16xf32> to vector<32x16xf32>
    %24 = vector.shape_cast %21 : vector<32x16xf32> to vector<1x32x16xf32>
    tpu.vector_store %arg5[%c0_13, %c0_14, %c0_15], %24 {strides = array<i32>} : memref<8x32x16xf32, #tpu.memory_space<vmem>>, vector<1x32x16xf32>,
    %25 = vector.extract_strided_slice %18 {offsets = [0, 8], sizes = [32, 8], strides = [1, 1]} : vector<32x64xf32> to vector<32x8xf32>
    %cst_16 = arith.constant dense<0.000000e+00> : vector<32x16xf32>
    %26 = tpu.matmul %25, %19, %cst_16 {dimension_numbers = #tpu.dot_dimension_numbers<[1], [0], [0], [1], [0, 0, 1, 1], [], []>} : vector<32x8xf32>, vector<8x16xf32>, vector<32x16xf32> -> vector<32x16xf32>
    %c1 = arith.constant 1 : index
    %c0_17 = arith.constant 0 : index
    %c0_18 = arith.constant 0 : index
    %27 = vector.load %arg5[%c1, %c0_17, %c0_18] : memref<8x32x16xf32, #tpu.memory_space<vmem>>, vector<1x32x16xf32>
    %28 = vector.shape_cast %27 : vector<1x32x16xf32> to vector<32x16xf32>
    %29 = vector.shape_cast %26 : vector<32x16xf32> to vector<1x32x16xf32>
    tpu.vector_store %arg5[%c1, %c0_17, %c0_18], %29 {strides = array<i32>} : memref<8x32x16xf32, #tpu.memory_space<vmem>>, vector<1x32x16xf32>,
    %30 = vector.extract_strided_slice %18 {offsets = [0, 16], sizes = [32, 8], strides = [1, 1]} : vector<32x64xf32> to vector<32x8xf32>
    %cst_19 = arith.constant dense<0.000000e+00> : vector<32x16xf32>
    %31 = tpu.matmul %30, %19, %cst_19 {dimension_numbers = #tpu.dot_dimension_numbers<[1], [0], [0], [1], [0, 0, 1, 1], [], []>} : vector<32x8xf32>, vector<8x16xf32>, vector<32x16xf32> -> vector<32x16xf32>
    %c2 = arith.constant 2 : index
    %c0_20 = arith.constant 0 : index
    %c0_21 = arith.constant 0 : index
    %32 = vector.load %arg5[%c2, %c0_20, %c0_21] : memref<8x32x16xf32, #tpu.memory_space<vmem>>, vector<1x32x16xf32>
    %33 = vector.shape_cast %32 : vector<1x32x16xf32> to vector<32x16xf32>
    %34 = vector.shape_cast %31 : vector<32x16xf32> to vector<1x32x16xf32>
    tpu.vector_store %arg5[%c2, %c0_20, %c0_21], %34 {strides = array<i32>} : memref<8x32x16xf32, #tpu.memory_space<vmem>>, vector<1x32x16xf32>,
    %35 = vector.extract_strided_slice %18 {offsets = [0, 24], sizes = [32, 8], strides = [1, 1]} : vector<32x64xf32> to vector<32x8xf32>
    %cst_22 = arith.constant dense<0.000000e+00> : vector<32x16xf32>
    %36 = tpu.matmul %35, %19, %cst_22 {dimension_numbers = #tpu.dot_dimension_numbers<[1], [0], [0], [1], [0, 0, 1, 1], [], []>} : vector<32x8xf32>, vector<8x16xf32>, vector<32x16xf32> -> vector<32x16xf32>
    %c3 = arith.constant 3 : index
    %c0_23 = arith.constant 0 : index
    %c0_24 = arith.constant 0 : index
    %37 = vector.load %arg5[%c3, %c0_23, %c0_24] : memref<8x32x16xf32, #tpu.memory_space<vmem>>, vector<1x32x16xf32>
    %38 = vector.shape_cast %37 : vector<1x32x16xf32> to vector<32x16xf32>
    %39 = vector.shape_cast %36 : vector<32x16xf32> to vector<1x32x16xf32>
    tpu.vector_store %arg5[%c3, %c0_23, %c0_24], %39 {strides = array<i32>} : memref<8x32x16xf32, #tpu.memory_space<vmem>>, vector<1x32x16xf32>,
    %40 = vector.extract_strided_slice %18 {offsets = [0, 32], sizes = [32, 8], strides = [1, 1]} : vector<32x64xf32> to vector<32x8xf32>
    %cst_25 = arith.constant dense<0.000000e+00> : vector<32x16xf32>
    %41 = tpu.matmul %40, %19, %cst_25 {dimension_numbers = #tpu.dot_dimension_numbers<[1], [0], [0], [1], [0, 0, 1, 1], [], []>} : vector<32x8xf32>, vector<8x16xf32>, vector<32x16xf32> -> vector<32x16xf32>
    %c4 = arith.constant 4 : index
    %c0_26 = arith.constant 0 : index
    %c0_27 = arith.constant 0 : index
    %42 = vector.load %arg5[%c4, %c0_26, %c0_27] : memref<8x32x16xf32, #tpu.memory_space<vmem>>, vector<1x32x16xf32>
    %43 = vector.shape_cast %42 : vector<1x32x16xf32> to vector<32x16xf32>
    %44 = vector.shape_cast %41 : vector<32x16xf32> to vector<1x32x16xf32>
    tpu.vector_store %arg5[%c4, %c0_26, %c0_27], %44 {strides = array<i32>} : memref<8x32x16xf32, #tpu.memory_space<vmem>>, vector<1x32x16xf32>,
    %45 = vector.extract_strided_slice %18 {offsets = [0, 40], sizes = [32, 8], strides = [1, 1]} : vector<32x64xf32> to vector<32x8xf32>
    %cst_28 = arith.constant dense<0.000000e+00> : vector<32x16xf32>
    %46 = tpu.matmul %45, %19, %cst_28 {dimension_numbers = #tpu.dot_dimension_numbers<[1], [0], [0], [1], [0, 0, 1, 1], [], []>} : vector<32x8xf32>, vector<8x16xf32>, vector<32x16xf32> -> vector<32x16xf32>
    %c5 = arith.constant 5 : index
    %c0_29 = arith.constant 0 : index
    %c0_30 = arith.constant 0 : index
    %47 = vector.load %arg5[%c5, %c0_29, %c0_30] : memref<8x32x16xf32, #tpu.memory_space<vmem>>, vector<1x32x16xf32>
    %48 = vector.shape_cast %47 : vector<1x32x16xf32> to vector<32x16xf32>
    %49 = vector.shape_cast %46 : vector<32x16xf32> to vector<1x32x16xf32>
    tpu.vector_store %arg5[%c5, %c0_29, %c0_30], %49 {strides = array<i32>} : memref<8x32x16xf32, #tpu.memory_space<vmem>>, vector<1x32x16xf32>,
    %50 = vector.extract_strided_slice %18 {offsets = [0, 48], sizes = [32, 8], strides = [1, 1]} : vector<32x64xf32> to vector<32x8xf32>
    %cst_31 = arith.constant dense<0.000000e+00> : vector<32x16xf32>
    %51 = tpu.matmul %50, %19, %cst_31 {dimension_numbers = #tpu.dot_dimension_numbers<[1], [0], [0], [1], [0, 0, 1, 1], [], []>} : vector<32x8xf32>, vector<8x16xf32>, vector<32x16xf32> -> vector<32x16xf32>
    %c6 = arith.constant 6 : index
    %c0_32 = arith.constant 0 : index
    %c0_33 = arith.constant 0 : index
    %52 = vector.load %arg5[%c6, %c0_32, %c0_33] : memref<8x32x16xf32, #tpu.memory_space<vmem>>, vector<1x32x16xf32>
    %53 = vector.shape_cast %52 : vector<1x32x16xf32> to vector<32x16xf32>
    %54 = vector.shape_cast %51 : vector<32x16xf32> to vector<1x32x16xf32>
    tpu.vector_store %arg5[%c6, %c0_32, %c0_33], %54 {strides = array<i32>} : memref<8x32x16xf32, #tpu.memory_space<vmem>>, vector<1x32x16xf32>,
    %55 = vector.extract_strided_slice %18 {offsets = [0, 56], sizes = [32, 8], strides = [1, 1]} : vector<32x64xf32> to vector<32x8xf32>
    %cst_34 = arith.constant dense<0.000000e+00> : vector<32x16xf32>
    %56 = tpu.matmul %55, %19, %cst_34 {dimension_numbers = #tpu.dot_dimension_numbers<[1], [0], [0], [1], [0, 0, 1, 1], [], []>} : vector<32x8xf32>, vector<8x16xf32>, vector<32x16xf32> -> vector<32x16xf32>
    %c7 = arith.constant 7 : index
    %c0_35 = arith.constant 0 : index
    %c0_36 = arith.constant 0 : index
    %57 = vector.load %arg5[%c7, %c0_35, %c0_36] : memref<8x32x16xf32, #tpu.memory_space<vmem>>, vector<1x32x16xf32>
    %58 = vector.shape_cast %57 : vector<1x32x16xf32> to vector<32x16xf32>
    %59 = vector.shape_cast %56 : vector<32x16xf32> to vector<1x32x16xf32>
    tpu.vector_store %arg5[%c7, %c0_35, %c0_36], %59 {strides = array<i32>} : memref<8x32x16xf32, #tpu.memory_space<vmem>>, vector<1x32x16xf32>,
    return
  }
  func.func @transform_0(%arg0: i32) -> (i32, i32, i32) {
    %c0_i32 = arith.constant 0 : i32
    %c0_i32_0 = arith.constant 0 : i32
    %c0_i32_1 = arith.constant 0 : i32
    return %arg0, %c0_i32, %c0_i32_0 : i32, i32, i32
  }
  func.func @transform_1(%arg0: i32) -> (i32, i32) {
    %c0_i32 = arith.constant 0 : i32
    %c0_i32_0 = arith.constant 0 : i32
    %c0_i32_1 = arith.constant 0 : i32
    return %c0_i32, %c0_i32_0 : i32, i32
  }
  func.func @transform_2(%arg0: i32) -> (i32, i32) {
    %c0_i32 = arith.constant 0 : i32
    %c0_i32_0 = arith.constant 0 : i32
    %c0_i32_1 = arith.constant 0 : i32
    return %c0_i32, %c0_i32_0 : i32, i32
  }
  func.func @transform_3(%arg0: i32) -> (i32, i32) {
    %c0_i32 = arith.constant 0 : i32
    %c0_i32_0 = arith.constant 0 : i32
    %c0_i32_1 = arith.constant 0 : i32
    return %c0_i32, %c0_i32_0 : i32, i32
  }
  func.func @transform_4(%arg0: i32) -> (i32, i32, i32) {
    %c0_i32 = arith.constant 0 : i32
    %c0_i32_0 = arith.constant 0 : i32
    %c0_i32_1 = arith.constant 0 : i32
    return %arg0, %c0_i32, %c0_i32_0 : i32, i32, i32
  }
}

</mosaic_0001>

<bundles_post_ra>
// kernel: tpu_custom_call.1
= control target key start
LH: loop header
LB: loop body
LE: loop exit
PB: predicated region body
PF: predicated region fallthrough
CT: control target
= control target key end

     0   :  { %s1492_s15 = smov 0   ;;  %s1667_s0 = inlined_call_operand.vmem [shape: bf16[2,16,64], index: 0, kind: input, shape index: {}]   ;;  %s1668_s1 = inlined_call_operand.vmem [shape: bf16[32,16], index: 1, kind: input, shape index: {}]   ;;  %s1669_s2 = inlined_call_operand.vmem [shape: f32[32,1], index: 2, kind: input, shape index: {}]   ;;  %s1670_s3 = inlined_call_operand.vmem [shape: f32[8,16], index: 3, kind: input, shape index: {}]   ;;  %s1671_s4 = inlined_call_operand.vmem [shape: f32[16,32,16], index: 4, kind: output, shape index: {}]  }
   0x1 LB: > { %s1498_s16 = sadd.s32 4294967295, %s1457_s15   ;;  %p1240_p0 = scmp.ge.s32.totalorder %s1457_s15, 1  ;;  %s1457_s15 = sphi %s1492_s15, %s14_s15  }
   0x2   : > { %p162_p1 = scmp.lt.s32.totalorder %s1457_s15, 3 }
   0x4   : > { %p163_p2 = pnand %p1240_p0, %p162_p1 }
   0x5   : > { %p189_p3 = scmp.lt.s32.totalorder (!%p163_p2), %s1498_s16, 1  ;;  %s1460_s10 = smov (!%p163_p2), 104  }
   0x6   : > { %166 = sbr.rel (%p163_p2) target bundleno = 580 (0x244), region = 36  ;;  %s1461_s11 = smov (!%p163_p2), 120  }
   0x7   : > { %s1462_s12 = smov (!%p163_p2), 88   ;;  %s1463_s13 = smov (!%p163_p2), 112  }
   0x8   : > { %s1464_s14 = smov (!%p163_p2), 96   ;;  %s1465_s17 = smov (!%p163_p2), 80  }
   0x9   : > { %s1466_s18 = smov (!%p163_p2), 72  }
   0xb   : > { %v1449_v0 = vld [vmem:[%s1668_s1] sm:$0xff]   ;;  %vm248_vm0 = vcmask 130048   ;;  %s190_s19 = scalar_select %p189_p3, %s1498_s16, 1  ;;  %v210_v2 = vld [vmem:[%s1669_s2 + $0x10] sm:$0xff]  ;;  %v1459_v3 = vmov 0   ;;  %v209_v4 = vld [vmem:[%s1669_s2 + $0x8] sm:$0xff] }
   0xc   : > { %1360 = vmatprep.mubr.msk.bf16.mxu0 %vm248_vm0, %v1449_v0  ;;  %v208_v1 = vld [vmem:[%s1669_s2] sm:$0xff]  ;;  %1447 = vset.pattern.permute.xlu1 %v1459_v3  ;;  %v211_v5 = vld [vmem:[%s1669_s2 + $0x18] sm:$0xff]  ;;  %v1450_v7 = vld [vmem:[%s1668_s1 + $0x8] sm:$0xff]   ;;  %vm334_vm1 = vcmask 64512  }
   0xd   : > { %1446 = vset.pattern.permute.xlu0 %v1459_v3  ;;  %s1313_s24 = sshll.u32 %s190_s19, 3  ;;  %214 = vperm.xlu1 %1447, %v208_v1   ;;  %v1530_v8 = vld [vmem:[%s1670_s3] sm:$0xff]  ;;  %s1243_s19 = sshll.u32 %s1498_s16, 3 }
   0xe   : > { %224 = vperm.xlu0 %1446, %v210_v2   ;;  %s193_s27 = scalar_lea.vmem %s1667_s0, %s1313_s24  ;;  %1428 = vmatprep.subr.mxu1 %v1530_v8  ;;  %p195_p4 = scmp.lt.s32.totalorder %s1243_s19, 15 }
   0xf   : > { %v1448_v6 = vld [vmem:[%s193_s27] sm:$0xff]   ;;  %1429 = vmatpush3.msra.mxu1 %v1530_v8 }
  0x10   : > { %1358 = vmatprep.subr.bf16.mxu0 %v1448_v6  ;;  %1372 = vmatprep.subr.mxu1 %v1530_v8  ;;  %s1673_s19 = smov (!%p195_p4, %s1243_s19), 15 }
  0x11   : > { %219 = vperm.xlu1 %1447, %v209_v4   ;;  %1359 = vmatpush3.bf16.msra.mxu0 %v1448_v6  ;;  %s1314_s20 = sshll.u32 %s1673_s19, 5 }
  0x12   : > { %229 = vperm.xlu0 %1446, %v211_v5   ;;  %1364 = vmatprep.subr.mxu0 %v1530_v8  ;;  %s1598_s23 = scalar_lea.vmem %s1671_s4, %s1314_s20 }
  0x14   : > { %1361 = vmatmul.mubr.msk.bf16.vlgmr.msra.gmra.mxu0 %vm248_vm0, %v1450_v7 }
  0x15   : > { %1365 = vmatpush3.msra.mxu0 %v1530_v8 }
  0x16   : > { %1380 = vmatprep.subr.mxu0 %v1530_v8 }
  0x88   : > { %v215_v10 = vpop.permute.xlu1 %214 }
  0x89   : > { %v225_v9 = vpop.permute.xlu0 %224 }
  0x8c   : > { %v220_v20 = vpop.permute.xlu1 %219 }
  0x8d   : > { %v230_v14 = vpop.permute.xlu0 %229 }
  0xd4   : > { %v1362_v11 = vpop.f32.mrf.mxu0 }
  0xd5   : > { %v298_v12 = vadd.f32 %v1362_v11, %v225_v9 }
  0xd6   : > { %v289_v13 = vpop.f32.mrf.mxu0 }
  0xd7   : > { %v311_v15 = vadd.f32 3.0, %v298_v12  ;;  %v290_v16 = vadd.f32 %v289_v13, %v215_v10 }
  0xd8   : > { %v1363_v17 = vpop.f32.mrf.mxu0 }
  0xd9   : > { %v315_v18 = vmax.f32 %v311_v15, 0.0  ;;  %v301_v19 = vadd.f32 %v1363_v17, %v230_v14  ;;  %648 = vrot.lane.b32.xlu1 %v290_v16, %s1460_s10  ;;  %436 = vrot.lane.b32.xlu0 %v290_v16, %s1461_s11 }
  0xda   : > { %1366 = vmatprep.mubr.msk.f32.mxu0 %vm334_vm1, %v290_v16  ;;  %v292_v21 = vpop.f32.mrf.mxu0 }
  0xdb   : > { %v319_v22 = vmin.f32 %v315_v18, 6.0  ;;  %v312_v23 = vadd.f32 3.0, %v301_v19  ;;  %v293_v24 = vadd.f32 %v292_v21, %v220_v20 }
  0xdd   : > { %v323_v25 = vmul.f32 0.16666667, %v319_v22  ;;  %v316_v26 = vmax.f32 %v312_v23, 0.0  ;;  %860 = vrot.lane.b32.xlu1 %v290_v16, %s1462_s12  ;;  %542 = vrot.lane.b32.xlu0 %v290_v16, %s1463_s13 }
  0xde   : > { %1367 = vmatmul.mubr.msk.f32.vlgmr.msra.gmra.mxu0 %vm334_vm1, %v293_v24 }
  0xdf   : > { %v320_v27 = vmin.f32 %v316_v26, 6.0  ;;  %1369 = vmatprep.mubr.msk.f32.mxu1 %vm334_vm1, %v323_v25  ;;  %1381 = vmatpush3.msra.mxu0 %v1530_v8 }
  0xe0   : > { %1396 = vmatprep.subr.mxu0 %v1530_v8 }
  0xe1   : > { %v324_v28 = vmul.f32 0.16666667, %v320_v27  ;;  %438 = vrot.lane.b32.xlu1 %v293_v24, %s1461_s11  ;;  %754 = vrot.lane.b32.xlu0 %v290_v16, %s1464_s14 }
  0xe3   : > { %1370 = vmatmul.mubr.msk.f32.vlgmr.msra.gmra.mxu1 %vm334_vm1, %v324_v28 }
  0xe4   : > { %1373 = vmatpush3.msra.mxu1 %v1530_v8 }
  0xe5   : > { %650 = vrot.lane.b32.xlu1 %v293_v24, %s1460_s10  ;;  %966 = vrot.lane.b32.xlu0 %v290_v16, %s1465_s17 }
  0xe6   : > { %1388 = vmatprep.subr.mxu1 %v1530_v8 }
  0xe9   : > { %862 = vrot.lane.b32.xlu1 %v293_v24, %s1462_s12  ;;  %544 = vrot.lane.b32.xlu0 %v293_v24, %s1463_s13 }
  0xed   : > { %652 = vrot.lane.b32.xlu1 %v323_v25, %s1460_s10  ;;  %756 = vrot.lane.b32.xlu0 %v293_v24, %s1464_s14 }
  0xf1   : > { %864 = vrot.lane.b32.xlu1 %v323_v25, %s1462_s12  ;;  %440 = vrot.lane.b32.xlu0 %v323_v25, %s1461_s11 }
  0xf5   : > { %442 = vrot.lane.b32.xlu1 %v324_v28, %s1461_s11  ;;  %546 = vrot.lane.b32.xlu0 %v323_v25, %s1463_s13 }
  0xf9   : > { %1072 = vrot.lane.b32.xlu1 %v290_v16, %s1466_s18  ;;  %758 = vrot.lane.b32.xlu0 %v323_v25, %s1464_s14 }
  0xfd   : > { %654 = vrot.lane.b32.xlu1 %v324_v28, %s1460_s10  ;;  %548 = vrot.lane.b32.xlu0 %v324_v28, %s1463_s13 }
 0x101   : > { %1074 = vrot.lane.b32.xlu1 %v293_v24, %s1466_s18  ;;  %968 = vrot.lane.b32.xlu0 %v293_v24, %s1465_s17 }
 0x105   : > { %866 = vrot.lane.b32.xlu1 %v324_v28, %s1462_s12  ;;  %760 = vrot.lane.b32.xlu0 %v324_v28, %s1464_s14 }
 0x109   : > { %1076 = vrot.lane.b32.xlu1 %v323_v25, %s1466_s18  ;;  %970 = vrot.lane.b32.xlu0 %v323_v25, %s1465_s17 }
 0x10d   : > { %1078 = vrot.lane.b32.xlu1 %v324_v28, %s1466_s18  ;;  %972 = vrot.lane.b32.xlu0 %v324_v28, %s1465_s17 }
 0x14b   : > { %v649_v29 = vpop.permute.xlu1 %648  ;;  %v437_v30 = vpop.permute.xlu0 %436 }
 0x14c   : > { %1374 = vmatprep.mubr.msk.f32.mxu1 %vm334_vm1, %v437_v30 }
 0x14f   : > { %v861_v31 = vpop.permute.xlu1 %860  ;;  %v543_v32 = vpop.permute.xlu0 %542 }
 0x150   : > { %1382 = vmatprep.mubr.msk.f32.mxu0 %vm334_vm1, %v543_v32 }
 0x153   : > { %v439_v33 = vpop.permute.xlu1 %438  ;;  %v755_v34 = vpop.permute.xlu0 %754 }
 0x154   : > { %1375 = vmatmul.mubr.msk.f32.vlgmr.msra.gmra.mxu1 %vm334_vm1, %v439_v33 }
 0x155   : > { %1389 = vmatpush3.msra.mxu1 %v1530_v8 }
 0x156   : > { %1404 = vmatprep.subr.mxu1 %v1530_v8 }
 0x157   : > { %v651_v35 = vpop.permute.xlu1 %650  ;;  %v967_v36 = vpop.permute.xlu0 %966 }
 0x15b   : > { %v863_v37 = vpop.permute.xlu1 %862  ;;  %v545_v38 = vpop.permute.xlu0 %544 }
 0x15c   : > { %1383 = vmatmul.mubr.msk.f32.vlgmr.msra.gmra.mxu0 %vm334_vm1, %v545_v38 }
 0x15d   : > { %1397 = vmatpush3.msra.mxu0 %v1530_v8 }
 0x15e   : > { %1412 = vmatprep.subr.mxu0 %v1530_v8 }
 0x15f   : > { %v653_v39 = vpop.permute.xlu1 %652  ;;  %v757_v40 = vpop.permute.xlu0 %756 }
 0x163   : > { %v865_v41 = vpop.permute.xlu1 %864  ;;  %v441_v42 = vpop.permute.xlu0 %440 }
 0x164   : > { %1377 = vmatprep.mubr.msk.f32.mxu1 %vm334_vm1, %v441_v42 }
 0x167   : > { %v443_v43 = vpop.permute.xlu1 %442  ;;  %v547_v44 = vpop.permute.xlu0 %546 }
 0x168   : > { %1378 = vmatmul.mubr.msk.f32.gmra.mxu1 %vm334_vm1, %v443_v43  ;;  %1385 = vmatprep.mubr.msk.f32.mxu0 %vm334_vm1, %v547_v44 }
 0x169   : > { %1390 = vmatprep.mubr.msk.f32.mxu1 %vm334_vm1, %v649_v29 }
 0x16b   : > { %v1073_v45 = vpop.permute.xlu1 %1072  ;;  %v759_v46 = vpop.permute.xlu0 %758 }
 0x16c   : > { %1391 = vmatmul.mubr.msk.f32.vlgmr.msra.gmra.mxu1 %vm334_vm1, %v651_v35 }
 0x16d   : > { %1405 = vmatpush3.msra.mxu1 %v1530_v8  ;;  %1393 = vmatprep.mubr.msk.f32.mxu1 %vm334_vm1, %v653_v39 }
 0x16e   : > { %1420 = vmatprep.subr.mxu1 %v1530_v8 }
 0x16f   : > { %v655_v47 = vpop.permute.xlu1 %654  ;;  %v549_v48 = vpop.permute.xlu0 %548 }
 0x170   : > { %1386 = vmatmul.mubr.msk.f32.gmra.mxu0 %vm334_vm1, %v549_v48  ;;  %1394 = vmatmul.mubr.msk.f32.gmra.mxu1 %vm334_vm1, %v655_v47 }
 0x171   : > { %1398 = vmatprep.mubr.msk.f32.mxu0 %vm334_vm1, %v755_v34  ;;  %1406 = vmatprep.mubr.msk.f32.mxu1 %vm334_vm1, %v861_v31 }
 0x173   : > { %v1075_v49 = vpop.permute.xlu1 %1074  ;;  %v969_v50 = vpop.permute.xlu0 %968 }
 0x174   : > { %1399 = vmatmul.mubr.msk.f32.vlgmr.msra.gmra.mxu0 %vm334_vm1, %v757_v40  ;;  %1407 = vmatmul.mubr.msk.f32.vlgmr.msra.gmra.mxu1 %vm334_vm1, %v863_v37 }
 0x175   : > { %1413 = vmatpush3.msra.mxu0 %v1530_v8  ;;  %1421 = vmatpush3.msra.mxu1 %v1530_v8 }
 0x176   : > { %1401 = vmatprep.mubr.msk.f32.mxu0 %vm334_vm1, %v759_v46  ;;  %1409 = vmatprep.mubr.msk.f32.mxu1 %vm334_vm1, %v865_v41 }
 0x177   : > { %v867_v51 = vpop.permute.xlu1 %866  ;;  %v761_v52 = vpop.permute.xlu0 %760 }
 0x178   : > { %1402 = vmatmul.mubr.msk.f32.gmra.mxu0 %vm334_vm1, %v761_v52  ;;  %1410 = vmatmul.mubr.msk.f32.gmra.mxu1 %vm334_vm1, %v867_v51 }
 0x179   : > { %1414 = vmatprep.mubr.msk.f32.mxu0 %vm334_vm1, %v967_v36  ;;  %1422 = vmatprep.mubr.msk.f32.mxu1 %vm334_vm1, %v1073_v45 }
 0x17b   : > { %v1077_v53 = vpop.permute.xlu1 %1076  ;;  %v971_v54 = vpop.permute.xlu0 %970 }
 0x17c   : > { %1415 = vmatmul.mubr.msk.f32.vlgmr.msra.gmra.mxu0 %vm334_vm1, %v969_v50  ;;  %1423 = vmatmul.mubr.msk.f32.vlgmr.msra.gmra.mxu1 %vm334_vm1, %v1075_v49 }
 0x17d   : > { %1417 = vmatprep.mubr.msk.f32.mxu0 %vm334_vm1, %v971_v54  ;;  %1425 = vmatprep.mubr.msk.f32.mxu1 %vm334_vm1, %v1077_v53 }
 0x17f   : > { %v1079_v55 = vpop.permute.xlu1 %1078  ;;  %v973_v56 = vpop.permute.xlu0 %972 }
 0x180   : > { %1418 = vmatmul.mubr.msk.f32.gmra.mxu0 %vm334_vm1, %v973_v56  ;;  %1426 = vmatmul.mubr.msk.f32.gmra.mxu1 %vm334_vm1, %v1079_v55 }
 0x19e   : > { %v1368_v57 = vpop.f32.mrf.mxu0 }
 0x19f   : > { %433 = vst.msk [vmem:[%s1598_s23 + $0x8] sm:$0xff] %vm248_vm0, %v1368_v57 }
 0x1a0   : > { %v413_v58 = vpop.f32.mrf.mxu0 }
 0x1a1   : > { %432 = vst.msk [vmem:[%s1598_s23] sm:$0xff] %vm248_vm0, %v413_v58 }
 0x1a3   : > { %v1371_v59 = vpop.f32.mrf.mxu1 }
 0x1a4   : > { %435 = vst.msk [vmem:[%s1598_s23 + $0x18] sm:$0xff] %vm248_vm0, %v1371_v59 }
 0x1a5   : > { %v423_v60 = vpop.f32.mrf.mxu1 }
 0x1a6   : > { %434 = vst.msk [vmem:[%s1598_s23 + $0x10] sm:$0xff] %vm248_vm0, %v423_v60 }
 0x214   : > { %v1376_v61 = vpop.f32.mrf.mxu1 }
 0x215   : > { %1260 = vst.msk [vmem:[%s1598_s23 + $0x28] sm:$0xff] %vm248_vm0, %v1376_v61 }
 0x216   : > { %v518_v62 = vpop.f32.mrf.mxu1 }
 0x217   : > { %1259 = vst.msk [vmem:[%s1598_s23 + $0x20] sm:$0xff] %vm248_vm0, %v518_v62 }
 0x21c   : > { %v1384_v63 = vpop.f32.mrf.mxu0 }
 0x21d   : > { %1268 = vst.msk [vmem:[%s1598_s23 + $0x48] sm:$0xff] %vm248_vm0, %v1384_v63 }
 0x21e   : > { %v624_v0 = vpop.f32.mrf.mxu0 }
 0x21f   : > { %1267 = vst.msk [vmem:[%s1598_s23 + $0x40] sm:$0xff] %vm248_vm0, %v624_v0 }
 0x228   : > { %v1379_v1 = vpop.f32.mrf.mxu1 }
 0x229   : > { %1262 = vst.msk [vmem:[%s1598_s23 + $0x38] sm:$0xff] %vm248_vm0, %v1379_v1 }
 0x22a   : > { %v528_v2 = vpop.f32.mrf.mxu1 }
 0x22b   : > { %1261 = vst.msk [vmem:[%s1598_s23 + $0x30] sm:$0xff] %vm248_vm0, %v528_v2 }
 0x22c   : > { %v1392_v3 = vpop.f32.mrf.mxu1 }
 0x22d   : > { %1276 = vst.msk [vmem:[%s1598_s23 + $0x68] sm:$0xff] %vm248_vm0, %v1392_v3 }
 0x22e   : > { %v730_v4 = vpop.f32.mrf.mxu1 }
 0x22f   : > { %1275 = vst.msk [vmem:[%s1598_s23 + $0x60] sm:$0xff] %vm248_vm0, %v730_v4 }
 0x230   : > { %v1387_v5 = vpop.f32.mrf.mxu0  ;;  %v1395_v6 = vpop.f32.mrf.mxu1 }
 0x231   : > { %1270 = vst.msk [vmem:[%s1598_s23 + $0x58] sm:$0xff] %vm248_vm0, %v1387_v5  ;;  %1278 = vst.msk [vmem:[%s1598_s23 + $0x78] sm:$0xff] %vm248_vm0, %v1395_v6 }
 0x232   : > { %v634_v7 = vpop.f32.mrf.mxu0  ;;  %v740_v8 = vpop.f32.mrf.mxu1 }
 0x233   : > { %1269 = vst.msk [vmem:[%s1598_s23 + $0x50] sm:$0xff] %vm248_vm0, %v634_v7  ;;  %1277 = vst.msk [vmem:[%s1598_s23 + $0x70] sm:$0xff] %vm248_vm0, %v740_v8 }
 0x234   : > { %v1400_v9 = vpop.f32.mrf.mxu0  ;;  %v1408_v10 = vpop.f32.mrf.mxu1 }
 0x235   : > { %1284 = vst.msk [vmem:[%s1598_s23 + $0x88] sm:$0xff] %vm248_vm0, %v1400_v9  ;;  %1292 = vst.msk [vmem:[%s1598_s23 + $0xa8] sm:$0xff] %vm248_vm0, %v1408_v10 }
 0x236   : > { %v836_v11 = vpop.f32.mrf.mxu0  ;;  %v942_v12 = vpop.f32.mrf.mxu1 }
 0x237   : > { %1283 = vst.msk [vmem:[%s1598_s23 + $0x80] sm:$0xff] %vm248_vm0, %v836_v11  ;;  %1291 = vst.msk [vmem:[%s1598_s23 + $0xa0] sm:$0xff] %vm248_vm0, %v942_v12 }
 0x238   : > { %v1403_v13 = vpop.f32.mrf.mxu0  ;;  %v1411_v14 = vpop.f32.mrf.mxu1 }
 0x239   : > { %1286 = vst.msk [vmem:[%s1598_s23 + $0x98] sm:$0xff] %vm248_vm0, %v1403_v13  ;;  %1294 = vst.msk [vmem:[%s1598_s23 + $0xb8] sm:$0xff] %vm248_vm0, %v1411_v14 }
 0x23a   : > { %v846_v15 = vpop.f32.mrf.mxu0  ;;  %v952_v16 = vpop.f32.mrf.mxu1 }
 0x23b   : > { %1285 = vst.msk [vmem:[%s1598_s23 + $0x90] sm:$0xff] %vm248_vm0, %v846_v15  ;;  %1293 = vst.msk [vmem:[%s1598_s23 + $0xb0] sm:$0xff] %vm248_vm0, %v952_v16 }
 0x23c   : > { %v1416_v17 = vpop.f32.mrf.mxu0  ;;  %v1424_v18 = vpop.f32.mrf.mxu1 }
 0x23d   : > { %1300 = vst.msk [vmem:[%s1598_s23 + $0xc8] sm:$0xff] %vm248_vm0, %v1416_v17  ;;  %1308 = vst.msk [vmem:[%s1598_s23 + $0xe8] sm:$0xff] %vm248_vm0, %v1424_v18 }
 0x23e   : > { %v1048_v19 = vpop.f32.mrf.mxu0  ;;  %v1154_v20 = vpop.f32.mrf.mxu1 }
 0x23f   : > { %1299 = vst.msk [vmem:[%s1598_s23 + $0xc0] sm:$0xff] %vm248_vm0, %v1048_v19  ;;  %1307 = vst.msk [vmem:[%s1598_s23 + $0xe0] sm:$0xff] %vm248_vm0, %v1154_v20 }
 0x240   : > { %v1419_v21 = vpop.f32.mrf.mxu0  ;;  %v1427_v22 = vpop.f32.mrf.mxu1 }
 0x241   : > { %1302 = vst.msk [vmem:[%s1598_s23 + $0xd8] sm:$0xff] %vm248_vm0, %v1419_v21  ;;  %1310 = vst.msk [vmem:[%s1598_s23 + $0xf8] sm:$0xff] %vm248_vm0, %v1427_v22 }
 0x242   : > { %v1058_v23 = vpop.f32.mrf.mxu0  ;;  %v1164_v24 = vpop.f32.mrf.mxu1 }
 0x243   : > { %1301 = vst.msk [vmem:[%s1598_s23 + $0xd0] sm:$0xff] %vm248_vm0, %v1058_v23  ;;  %1309 = vst.msk [vmem:[%s1598_s23 + $0xf0] sm:$0xff] %vm248_vm0, %v1164_v24 }
 0x244 PF: > { %s14_s15 = sadd.s32 1, %s1457_s15  }
 0x245   : > { %p11_p5 = scmp.ge.s32.totalorder %s14_s15, 4  }
 0x247   :  { %13 = sbr.rel (!%p11_p5) target bundleno = 1 (0x1), region = 73 }

</bundles_post_ra>
